<compile_context>
chip_gen: v5e
topology: v5e:2x2
jax: 0.10.0
libtpu: 0.0.40
codegen_flags: <defaults>
</compile_context>

<pallas_src>
import functools

import jax
import jax.numpy as jnp
from jax.experimental import pallas as pl
from jax.experimental.pallas import tpu as pltpu

BN_EPS = 1e-5


# ------------------------------- kernel ---------------------------------------------
def _conv3_cols(w_ref, b_ref, xm1, x0, xp1):
    """k=3 conv + folded-BN bias, taps given explicitly (any column width)."""
    acc = jnp.dot(w_ref[0], xm1, preferred_element_type=jnp.float32)
    acc += jnp.dot(w_ref[1], x0, preferred_element_type=jnp.float32)
    acc += jnp.dot(w_ref[2], xp1, preferred_element_type=jnp.float32)
    return acc + b_ref[...]


def _conv3_same(w_ref, b_ref, h, left_col, right_col):
    """'same' k=3 conv over a TL-wide tile; the two neighbour columns are passed in."""
    tap_m1 = jnp.concatenate([left_col, h[:, :-1]], axis=1)   # col j -> h[:, j-1]
    tap_p1 = jnp.concatenate([h[:, 1:], right_col], axis=1)   # col j -> h[:, j+1]
    return _conv3_cols(w_ref, b_ref, tap_m1, h, tap_p1)


def _resnet_block_kernel(x_ref, lc_ref, rc_ref, w1_ref, w2_ref, w3_ref,
                         b1_ref, b2_ref, b3_ref, o_ref, *, L, TL, ragged):
    # x_ref : (Ci, TL) f32   tile = original columns [t*TL, t*TL + TL)
    # lc_ref: (Ci, 2)  f32   original columns t*TL-2, t*TL-1 (zeros outside [0, L))
    # rc_ref: (Ci, 2)  f32   original columns t*TL+TL, t*TL+TL+1 (zeros outside [0, L))
    # w?_ref: BN-scale-folded conv weights, bf16; b?_ref: folded BN bias, (Cout, 1) f32
    t = pl.program_id(1)

    xb = x_ref[...].astype(jnp.bfloat16)
    lc = lc_ref[...].astype(jnp.bfloat16)
    rc = rc_ref[...].astype(jnp.bfloat16)

    if ragged:
        # Only generated when L % TL != 0: zero the garbage columns of the partial
        # last block so conv1/conv2 see proper 'same' padding at the sequence end.
        keep = (jax.lax.broadcasted_iota(jnp.int32, (1, TL), 1) + t * TL) < L
        xb = jnp.where(keep, xb, 0.0)

    # ---- conv1 (k=3) + BN + ReLU ----
    y1 = jnp.maximum(_conv3_same(w1_ref, b1_ref, xb, lc[:, 1:2], rc[:, 0:1]), 0.0)

    # y1 at columns t*TL-1 and t*TL+TL (conv2's neighbours across the tile boundary);
    # forced to zero where those columns fall outside [0, L) (conv2's 'same' padding).
    y1_m1 = jnp.maximum(_conv3_cols(w1_ref, b1_ref, lc[:, 0:1], lc[:, 1:2], xb[:, 0:1]), 0.0)
    y1_m1 = jnp.where(t > 0, y1_m1, 0.0)
    y1_p1 = jnp.maximum(_conv3_cols(w1_ref, b1_ref, xb[:, -1:], rc[:, 0:1], rc[:, 1:2]), 0.0)
    y1_p1 = jnp.where((t + 1) * TL < L, y1_p1, 0.0)

    if ragged:
        y1 = jnp.where(keep, y1, 0.0)   # zeros beyond L so conv2's padding is correct

    # ---- conv2 (k=3) + BN + ReLU ----
    y2 = jnp.maximum(
        _conv3_same(w2_ref, b2_ref, y1.astype(jnp.bfloat16),
                    y1_m1.astype(jnp.bfloat16), y1_p1.astype(jnp.bfloat16)), 0.0)

    # ---- conv3 (k=1) + BN (exactly TL columns) ----
    y3 = jnp.dot(w3_ref[...], y2.astype(jnp.bfloat16),
                 preferred_element_type=jnp.float32) + b3_ref[...]

    # ---- residual add + ReLU (f32 residual read straight from the ref) ----
    o_ref[...] = jnp.maximum(x_ref[...] + y3, 0.0).astype(o_ref.dtype)


# ------------------------------- wrapper --------------------------------------------
def _round_down(x, m):
    return (x // m) * m


def _fold_bn(gamma, beta, mean, var):
    scale = gamma * jax.lax.rsqrt(var + BN_EPS)
    return scale, beta - mean * scale


def _fold_conv3_weight(w, scale):
    # torch (Cout, Cin, 3) conv weight * per-Cout BN scale -> (3, Cout, Cin) bf16
    # (one weight slab per tap; tap k multiplies x[:, j - 1 + k], matching torch).
    wf = w * scale[:, None, None]
    return jnp.transpose(wf, (2, 0, 1)).astype(jnp.bfloat16)


def _vmem_limit_bytes(Ci, C1, C2, TL):
    blocks = 2 * 2 * 4 * Ci * TL                              # double-buffered x + out blocks (f32)
    interm = 4 * TL * (3 * Ci + 3 * C1 + 3 * C2)              # taps / y1 / y2 / y3 (rough)
    weights = 2 * 2 * (3 * C1 * Ci + 3 * C2 * C1 + Ci * C2)
    est = blocks + interm + weights + (4 << 20)
    # <= 48 MiB keeps headroom on v7x (64 MiB physical); v5e/v6e can go higher if needed.
    return int(min(max(est, 32 << 20), 48 << 20))


@functools.partial(jax.jit, static_argnames=("tile_l",))
def resnet_block1(x_ncl, params, tile_l=2048):
    """x_ncl: (B, Ci, L) float32 in PyTorch NCL layout (C on sublanes, L on lanes)."""
    B, Ci, L = x_ncl.shape
    C1 = params["w1"].shape[0]
    C2 = params["w2"].shape[0]

    tl = max(128, _round_down(int(tile_l), 128))
    if L <= tl:
        TL, T = L, 1                     # one tile covering the whole sequence
    else:
        TL, T = tl, pl.cdiv(L, tl)       # 128-aligned tiles; last one may be partial
    ragged = (T > 1) and (L % TL != 0)

    # ---- fold eval-mode BatchNorm into the conv weights (f32 fold, bf16 cast) ----
    s1, b1 = _fold_bn(params["g1"], params["be1"], params["m1"], params["v1"])
    s2, b2 = _fold_bn(params["g2"], params["be2"], params["m2"], params["v2"])
    s3, b3 = _fold_bn(params["g3"], params["be3"], params["m3"], params["v3"])
    w1 = _fold_conv3_weight(params["w1"], s1)                         # (3, C1, Ci) bf16
    w2 = _fold_conv3_weight(params["w2"], s2)                         # (3, C2, C1) bf16
    w3 = (params["w3"][:, :, 0] * s3[:, None]).astype(jnp.bfloat16)   # (Ci, C2)    bf16
    b1 = b1[:, None].astype(jnp.float32)                              # (C1, 1)
    b2 = b2[:, None].astype(jnp.float32)                              # (C2, 1)
    b3 = b3[:, None].astype(jnp.float32)                              # (Ci, 1)

    # ---- tiny per-tile boundary context (2 columns each side of every tile) ----
    starts = jnp.arange(T, dtype=jnp.int32) * TL
    l_idx = starts[:, None] + jnp.arange(-2, 0, dtype=jnp.int32)[None, :]        # (T, 2)
    r_idx = starts[:, None] + TL + jnp.arange(0, 2, dtype=jnp.int32)[None, :]    # (T, 2)

    def gather_ctx(idx):
        valid = (idx >= 0) & (idx < L)
        g = jnp.take(x_ncl, jnp.clip(idx, 0, L - 1).reshape(-1), axis=2)
        g = g.reshape(B, Ci, T, 2)
        g = jnp.where(valid[None, None, :, :], g, 0.0)
        return jnp.transpose(g, (0, 2, 1, 3))                                    # (B, T, Ci, 2)

    lctx = gather_ctx(l_idx)
    rctx = gather_ctx(r_idx)

    kernel = functools.partial(_resnet_block_kernel, L=L, TL=TL, ragged=ragged)

    def const(shape):
        zeros = (0,) * len(shape)
        return pl.BlockSpec(shape, lambda b, t: zeros)

    out = pl.pallas_call(
        kernel,
        out_shape=jax.ShapeDtypeStruct((B, Ci, L), x_ncl.dtype),
        grid=(B, T),
        in_specs=[
            pl.BlockSpec((None, Ci, TL), lambda b, t: (b, 0, t)),        # x tile
            pl.BlockSpec((None, None, Ci, 2), lambda b, t: (b, t, 0, 0)),  # left ctx
            pl.BlockSpec((None, None, Ci, 2), lambda b, t: (b, t, 0, 0)),  # right ctx
            const((3, C1, Ci)), const((3, C2, C1)), const((Ci, C2)),       # folded weights
            const((C1, 1)), const((C2, 1)), const((Ci, 1)),                # folded BN biases
        ],
        out_specs=pl.BlockSpec((None, Ci, TL), lambda b, t: (b, 0, t)),
        compiler_params=pltpu.CompilerParams(
            dimension_semantics=("parallel", "parallel"),
            vmem_limit_bytes=_vmem_limit_bytes(Ci, C1, C2, TL),
        ),
    )(x_ncl, lctx, rctx, w1, w2, w3, b1, b2, b3)
    return out


# ---------------- pure-JAX reference (f32, for correctness check) ----------------
def _ref_conv1d(x_ncl, w, pad):
    return jax.lax.conv_general_dilated(
        x_ncl, w, window_strides=(1,), padding=[(pad, pad)],
        dimension_numbers=("NCH", "OIH", "NCH"))


def _ref_bn(x_ncl, gamma, beta, mean, var):
    g = gamma[None, :, None]
    b = beta[None, :, None]
    m = mean[None, :, None]
    v = var[None, :, None]
    return (x_ncl - m) / jnp.sqrt(v + BN_EPS) * g + b


def resnet_block1_ref(x, p):
    y = jax.nn.relu(_ref_bn(_ref_conv1d(x, p["w1"], 1), p["g1"], p["be1"], p["m1"], p["v1"]))
    y = jax.nn.relu(_ref_bn(_ref_conv1d(y, p["w2"], 1), p["g2"], p["be2"], p["m2"], p["v2"]))
    y = _ref_bn(_ref_conv1d(y, p["w3"], 0), p["g3"], p["be3"], p["m3"], p["v3"])
    return jax.nn.relu(x + y)


def init_params(key, Ci):
    C1 = C2 = Ci * 2
    ks = jax.random.split(key, 12)
    return {
        "w1": jax.random.normal(ks[0], (C1, Ci, 3), jnp.float32) * 0.2,
        "w2": jax.random.normal(ks[1], (C2, C1, 3), jnp.float32) * 0.2,
        "w3": jax.random.normal(ks[2], (Ci, C2, 1), jnp.float32) * 0.2,
        "g1": 1.0 + 0.1 * jax.random.normal(ks[3], (C1,), jnp.float32),
        "be1": 0.1 * jax.random.normal(ks[4], (C1,), jnp.float32),
        "m1": 0.1 * jax.random.normal(ks[5], (C1,), jnp.float32),
        "v1": jnp.abs(jax.random.normal(ks[6], (C1,), jnp.float32)) + 0.5,
        "g2": 1.0 + 0.1 * jax.random.normal(ks[7], (C2,), jnp.float32),
        "be2": 0.1 * jax.random.normal(ks[8], (C2,), jnp.float32),
        "m2": 0.1 * jax.random.normal(ks[9], (C2,), jnp.float32),
        "v2": jnp.abs(jax.random.normal(ks[10], (C2,), jnp.float32)) + 0.5,
        "g3": jnp.ones((Ci,), jnp.float32),
        "be3": jnp.zeros((Ci,), jnp.float32),
        "m3": jnp.zeros((Ci,), jnp.float32),
        "v3": jnp.ones((Ci,), jnp.float32),
    }


if __name__ == "__main__":
    key = jax.random.PRNGKey(0)
    k_x, k_p, k_x2, k_x3 = jax.random.split(key, 4)

    B, Ci = 2, 4
    params = init_params(k_p, Ci)

    # --- single-tile path: B=2, Ci=4, L=16 ---
    x = jax.random.normal(k_x, (B, Ci, 16), jnp.float32)
    out = jax.block_until_ready(resnet_block1(x, params))
    ref = jax.block_until_ready(resnet_block1_ref(x, params))
    assert out.shape == x.shape
    # bf16 MXU operands with f32 accumulation -> loose tolerance (deliberate).
    assert jnp.allclose(out, ref, atol=5e-2, rtol=5e-2), "mismatch vs reference (single tile)"

    # --- multi-tile, ragged last tile: L=300, TL=128 -> 3 tiles, last has 44 valid cols ---
    x2 = jax.random.normal(k_x2, (B, Ci, 300), jnp.float32)
    out2 = jax.block_until_ready(resnet_block1(x2, params, tile_l=128))
    ref2 = jax.block_until_ready(resnet_block1_ref(x2, params))
    assert out2.shape == x2.shape
    assert jnp.allclose(out2, ref2, atol=5e-2, rtol=5e-2), "mismatch vs reference (ragged tiles)"

    # --- multi-tile, exact multiple: L=256, TL=128 -> 2 full tiles ---
    x3 = jax.random.normal(k_x3, (B, Ci, 256), jnp.float32)
    out3 = jax.block_until_ready(resnet_block1(x3, params, tile_l=128))
    ref3 = jax.block_until_ready(resnet_block1_ref(x3, params))
    assert out3.shape == x3.shape
    assert jnp.allclose(out3, ref3, atol=5e-2, rtol=5e-2), "mismatch vs reference (full tiles)"

    print("KERNEL_OK")
</pallas_src>

<mosaic_0001>
module attributes {stable_mosaic.version = 11 : i64} {
  func.func @_resnet_block_kernel(%arg0: i32, %arg1: i32, %arg2: memref<1x4x16xf32, #tpu.memory_space<vmem>>, %arg3: memref<1x1x4x2xf32, #tpu.memory_space<vmem>>, %arg4: memref<1x1x4x2xf32, #tpu.memory_space<vmem>>, %arg5: memref<3x8x4xbf16, #tpu.memory_space<vmem>>, %arg6: memref<3x8x8xbf16, #tpu.memory_space<vmem>>, %arg7: memref<4x8xbf16, #tpu.memory_space<vmem>>, %arg8: memref<8x1xf32, #tpu.memory_space<vmem>>, %arg9: memref<8x1xf32, #tpu.memory_space<vmem>>, %arg10: memref<4x1xf32, #tpu.memory_space<vmem>>, %arg11: memref<1x4x16xf32, #tpu.memory_space<vmem>>) attributes {dimension_semantics = [#tpu.dimension_semantics<parallel>, #tpu.dimension_semantics<parallel>], iteration_bounds = array<i64: 2, 1>, scalar_prefetch = 0 : i64, scratch_operands = 0 : i64, tpu.core_type = #tpu.core_type<tc>, window_params = [{transform_indices = @transform_0, window_bounds = array<i64: 1, 4, 16>}, {transform_indices = @transform_1, window_bounds = array<i64: 1, 1, 4, 2>}, {transform_indices = @transform_2, window_bounds = array<i64: 1, 1, 4, 2>}, {pipeline_mode = #tpu.pipeline_mode<synchronous>, transform_indices = @transform_3, window_bounds = array<i64: 3, 8, 4>}, {pipeline_mode = #tpu.pipeline_mode<synchronous>, transform_indices = @transform_4, window_bounds = array<i64: 3, 8, 8>}, {pipeline_mode = #tpu.pipeline_mode<synchronous>, transform_indices = @transform_5, window_bounds = array<i64: 4, 8>}, {pipeline_mode = #tpu.pipeline_mode<synchronous>, transform_indices = @transform_6, window_bounds = array<i64: 8, 1>}, {pipeline_mode = #tpu.pipeline_mode<synchronous>, transform_indices = @transform_7, window_bounds = array<i64: 8, 1>}, {pipeline_mode = #tpu.pipeline_mode<synchronous>, transform_indices = @transform_8, window_bounds = array<i64: 4, 1>}, {transform_indices = @transform_9, window_bounds = array<i64: 1, 4, 16>}]} {
    %c0 = arith.constant 0 : index
    %c0_0 = arith.constant 0 : index
    %c0_1 = arith.constant 0 : index
    %0 = vector.load %arg2[%c0, %c0_0, %c0_1] : memref<1x4x16xf32, #tpu.memory_space<vmem>>, vector<1x4x16xf32>
    %1 = vector.shape_cast %0 : vector<1x4x16xf32> to vector<4x16xf32>
    %2 = arith.truncf %1 : vector<4x16xf32> to vector<4x16xbf16>
    %c0_2 = arith.constant 0 : index
    %c0_3 = arith.constant 0 : index
    %c0_4 = arith.constant 0 : index
    %c0_5 = arith.constant 0 : index
    %3 = vector.load %arg3[%c0_2, %c0_3, %c0_4, %c0_5] : memref<1x1x4x2xf32, #tpu.memory_space<vmem>>, vector<1x1x4x2xf32>
    %4 = vector.shape_cast %3 : vector<1x1x4x2xf32> to vector<4x2xf32>
    %5 = arith.truncf %4 : vector<4x2xf32> to vector<4x2xbf16>
    %c0_6 = arith.constant 0 : index
    %c0_7 = arith.constant 0 : index
    %c0_8 = arith.constant 0 : index
    %c0_9 = arith.constant 0 : index
    %6 = vector.load %arg4[%c0_6, %c0_7, %c0_8, %c0_9] : memref<1x1x4x2xf32, #tpu.memory_space<vmem>>, vector<1x1x4x2xf32>
    %7 = vector.shape_cast %6 : vector<1x1x4x2xf32> to vector<4x2xf32>
    %8 = arith.truncf %7 : vector<4x2xf32> to vector<4x2xbf16>
    %9 = vector.extract_strided_slice %5 {offsets = [0, 1], sizes = [4, 1], strides = [1, 1]} : vector<4x2xbf16> to vector<4x1xbf16>
    %10 = vector.extract_strided_slice %8 {offsets = [0, 0], sizes = [4, 1], strides = [1, 1]} : vector<4x2xbf16> to vector<4x1xbf16>
    %11 = vector.extract_strided_slice %2 {offsets = [0, 0], sizes = [4, 15], strides = [1, 1]} : vector<4x16xbf16> to vector<4x15xbf16>
    %12 = tpu.concatenate %9, %11 in 1 : vector<4x1xbf16>, vector<4x15xbf16> -> vector<4x16xbf16>
    %13 = vector.extract_strided_slice %2 {offsets = [0, 1], sizes = [4, 15], strides = [1, 1]} : vector<4x16xbf16> to vector<4x15xbf16>
    %14 = tpu.concatenate %13, %10 in 1 : vector<4x15xbf16>, vector<4x1xbf16> -> vector<4x16xbf16>
    %c0_10 = arith.constant 0 : index
    %c0_11 = arith.constant 0 : index
    %c0_12 = arith.constant 0 : index
    %15 = vector.load %arg5[%c0_10, %c0_11, %c0_12] : memref<3x8x4xbf16, #tpu.memory_space<vmem>>, vector<1x8x4xbf16>
    %16 = vector.shape_cast %15 : vector<1x8x4xbf16> to vector<8x4xbf16>
    %cst = arith.constant dense<0.000000e+00> : vector<8x16xf32>
    %17 = tpu.matmul %16, %12, %cst {dimension_numbers = #tpu.dot_dimension_numbers<[1], [0], [0], [1], [0, 0, 1, 1], [], []>} : vector<8x4xbf16>, vector<4x16xbf16>, vector<8x16xf32> -> vector<8x16xf32>
    %c1 = arith.constant 1 : index
    %c0_13 = arith.constant 0 : index
    %c0_14 = arith.constant 0 : index
    %18 = vector.load %arg5[%c1, %c0_13, %c0_14] : memref<3x8x4xbf16, #tpu.memory_space<vmem>>, vector<1x8x4xbf16>
    %19 = vector.shape_cast %18 : vector<1x8x4xbf16> to vector<8x4xbf16>
    %cst_15 = arith.constant dense<0.000000e+00> : vector<8x16xf32>
    %20 = tpu.matmul %19, %2, %cst_15 {dimension_numbers = #tpu.dot_dimension_numbers<[1], [0], [0], [1], [0, 0, 1, 1], [], []>} : vector<8x4xbf16>, vector<4x16xbf16>, vector<8x16xf32> -> vector<8x16xf32>
    %21 = arith.addf %17, %20 : vector<8x16xf32>
    %c2 = arith.constant 2 : index
    %c0_16 = arith.constant 0 : index
    %c0_17 = arith.constant 0 : index
    %22 = vector.load %arg5[%c2, %c0_16, %c0_17] : memref<3x8x4xbf16, #tpu.memory_space<vmem>>, vector<1x8x4xbf16>
    %23 = vector.shape_cast %22 : vector<1x8x4xbf16> to vector<8x4xbf16>
    %cst_18 = arith.constant dense<0.000000e+00> : vector<8x16xf32>
    %24 = tpu.matmul %23, %14, %cst_18 {dimension_numbers = #tpu.dot_dimension_numbers<[1], [0], [0], [1], [0, 0, 1, 1], [], []>} : vector<8x4xbf16>, vector<4x16xbf16>, vector<8x16xf32> -> vector<8x16xf32>
    %25 = arith.addf %21, %24 : vector<8x16xf32>
    %c0_19 = arith.constant 0 : index
    %c0_20 = arith.constant 0 : index
    %26 = vector.load %arg8[%c0_19, %c0_20] : memref<8x1xf32, #tpu.memory_space<vmem>>, vector<8x1xf32>
    %27 = vector.broadcast %26 : vector<8x1xf32> to vector<8x16xf32>
    %28 = arith.addf %25, %27 : vector<8x16xf32>
    %cst_21 = arith.constant 0.000000e+00 : f32
    %29 = vector.broadcast %cst_21 : f32 to vector<8x16xf32>
    %30 = arith.maximumf %28, %29 : vector<8x16xf32>
    %31 = vector.extract_strided_slice %5 {offsets = [0, 0], sizes = [4, 1], strides = [1, 1]} : vector<4x2xbf16> to vector<4x1xbf16>
    %32 = vector.extract_strided_slice %5 {offsets = [0, 1], sizes = [4, 1], strides = [1, 1]} : vector<4x2xbf16> to vector<4x1xbf16>
    %33 = vector.extract_strided_slice %2 {offsets = [0, 0], sizes = [4, 1], strides = [1, 1]} : vector<4x16xbf16> to vector<4x1xbf16>
    %c0_22 = arith.constant 0 : index
    %c0_23 = arith.constant 0 : index
    %c0_24 = arith.constant 0 : index
    %34 = vector.load %arg5[%c0_22, %c0_23, %c0_24] : memref<3x8x4xbf16, #tpu.memory_space<vmem>>, vector<1x8x4xbf16>
    %35 = vector.shape_cast %34 : vector<1x8x4xbf16> to vector<8x4xbf16>
    %cst_25 = arith.constant dense<0.000000e+00> : vector<8x1xf32>
    %36 = tpu.matmul %35, %31, %cst_25 {dimension_numbers = #tpu.dot_dimension_numbers<[1], [0], [0], [1], [0, 0, 1, 1], [], []>} : vector<8x4xbf16>, vector<4x1xbf16>, vector<8x1xf32> -> vector<8x1xf32>
    %c1_26 = arith.constant 1 : index
    %c0_27 = arith.constant 0 : index
    %c0_28 = arith.constant 0 : index
    %37 = vector.load %arg5[%c1_26, %c0_27, %c0_28] : memref<3x8x4xbf16, #tpu.memory_space<vmem>>, vector<1x8x4xbf16>
    %38 = vector.shape_cast %37 : vector<1x8x4xbf16> to vector<8x4xbf16>
    %cst_29 = arith.constant dense<0.000000e+00> : vector<8x1xf32>
    %39 = tpu.matmul %38, %32, %cst_29 {dimension_numbers = #tpu.dot_dimension_numbers<[1], [0], [0], [1], [0, 0, 1, 1], [], []>} : vector<8x4xbf16>, vector<4x1xbf16>, vector<8x1xf32> -> vector<8x1xf32>
    %40 = arith.addf %36, %39 : vector<8x1xf32>
    %c2_30 = arith.constant 2 : index
    %c0_31 = arith.constant 0 : index
    %c0_32 = arith.constant 0 : index
    %41 = vector.load %arg5[%c2_30, %c0_31, %c0_32] : memref<3x8x4xbf16, #tpu.memory_space<vmem>>, vector<1x8x4xbf16>
    %42 = vector.shape_cast %41 : vector<1x8x4xbf16> to vector<8x4xbf16>
    %cst_33 = arith.constant dense<0.000000e+00> : vector<8x1xf32>
    %43 = tpu.matmul %42, %33, %cst_33 {dimension_numbers = #tpu.dot_dimension_numbers<[1], [0], [0], [1], [0, 0, 1, 1], [], []>} : vector<8x4xbf16>, vector<4x1xbf16>, vector<8x1xf32> -> vector<8x1xf32>
    %44 = arith.addf %40, %43 : vector<8x1xf32>
    %c0_34 = arith.constant 0 : index
    %c0_35 = arith.constant 0 : index
    %45 = vector.load %arg8[%c0_34, %c0_35] : memref<8x1xf32, #tpu.memory_space<vmem>>, vector<8x1xf32>
    %46 = arith.addf %44, %45 : vector<8x1xf32>
    %cst_36 = arith.constant 0.000000e+00 : f32
    %47 = vector.broadcast %cst_36 : f32 to vector<8x1xf32>
    %48 = arith.maximumf %46, %47 : vector<8x1xf32>
    %c0_i32 = arith.constant 0 : i32
    %49 = arith.cmpi sgt, %arg1, %c0_i32 : i32
    %cst_37 = arith.constant 0.000000e+00 : f32
    %50 = vector.broadcast %cst_37 : f32 to vector<8x1xf32>
    %51 = arith.select %49, %48, %50 : vector<8x1xf32>
    %52 = vector.extract_strided_slice %2 {offsets = [0, 15], sizes = [4, 1], strides = [1, 1]} : vector<4x16xbf16> to vector<4x1xbf16>
    %53 = vector.extract_strided_slice %8 {offsets = [0, 0], sizes = [4, 1], strides = [1, 1]} : vector<4x2xbf16> to vector<4x1xbf16>
    %54 = vector.extract_strided_slice %8 {offsets = [0, 1], sizes = [4, 1], strides = [1, 1]} : vector<4x2xbf16> to vector<4x1xbf16>
    %c0_38 = arith.constant 0 : index
    %c0_39 = arith.constant 0 : index
    %c0_40 = arith.constant 0 : index
    %55 = vector.load %arg5[%c0_38, %c0_39, %c0_40] : memref<3x8x4xbf16, #tpu.memory_space<vmem>>, vector<1x8x4xbf16>
    %56 = vector.shape_cast %55 : vector<1x8x4xbf16> to vector<8x4xbf16>
    %cst_41 = arith.constant dense<0.000000e+00> : vector<8x1xf32>
    %57 = tpu.matmul %56, %52, %cst_41 {dimension_numbers = #tpu.dot_dimension_numbers<[1], [0], [0], [1], [0, 0, 1, 1], [], []>} : vector<8x4xbf16>, vector<4x1xbf16>, vector<8x1xf32> -> vector<8x1xf32>
    %c1_42 = arith.constant 1 : index
    %c0_43 = arith.constant 0 : index
    %c0_44 = arith.constant 0 : index
    %58 = vector.load %arg5[%c1_42, %c0_43, %c0_44] : memref<3x8x4xbf16, #tpu.memory_space<vmem>>, vector<1x8x4xbf16>
    %59 = vector.shape_cast %58 : vector<1x8x4xbf16> to vector<8x4xbf16>
    %cst_45 = arith.constant dense<0.000000e+00> : vector<8x1xf32>
    %60 = tpu.matmul %59, %53, %cst_45 {dimension_numbers = #tpu.dot_dimension_numbers<[1], [0], [0], [1], [0, 0, 1, 1], [], []>} : vector<8x4xbf16>, vector<4x1xbf16>, vector<8x1xf32> -> vector<8x1xf32>
    %61 = arith.addf %57, %60 : vector<8x1xf32>
    %c2_46 = arith.constant 2 : index
    %c0_47 = arith.constant 0 : index
    %c0_48 = arith.constant 0 : index
    %62 = vector.load %arg5[%c2_46, %c0_47, %c0_48] : memref<3x8x4xbf16, #tpu.memory_space<vmem>>, vector<1x8x4xbf16>
    %63 = vector.shape_cast %62 : vector<1x8x4xbf16> to vector<8x4xbf16>
    %cst_49 = arith.constant dense<0.000000e+00> : vector<8x1xf32>
    %64 = tpu.matmul %63, %54, %cst_49 {dimension_numbers = #tpu.dot_dimension_numbers<[1], [0], [0], [1], [0, 0, 1, 1], [], []>} : vector<8x4xbf16>, vector<4x1xbf16>, vector<8x1xf32> -> vector<8x1xf32>
    %65 = arith.addf %61, %64 : vector<8x1xf32>
    %c0_50 = arith.constant 0 : index
    %c0_51 = arith.constant 0 : index
    %66 = vector.load %arg8[%c0_50, %c0_51] : memref<8x1xf32, #tpu.memory_space<vmem>>, vector<8x1xf32>
    %67 = arith.addf %65, %66 : vector<8x1xf32>
    %cst_52 = arith.constant 0.000000e+00 : f32
    %68 = vector.broadcast %cst_52 : f32 to vector<8x1xf32>
    %69 = arith.maximumf %67, %68 : vector<8x1xf32>
    %c1_i32 = arith.constant 1 : i32
    %70 = arith.addi %arg1, %c1_i32 : i32
    %c16_i32 = arith.constant 16 : i32
    %71 = arith.muli %70, %c16_i32 : i32
    %c16_i32_53 = arith.constant 16 : i32
    %72 = arith.cmpi slt, %71, %c16_i32_53 : i32
    %cst_54 = arith.constant 0.000000e+00 : f32
    %73 = vector.broadcast %cst_54 : f32 to vector<8x1xf32>
    %74 = arith.select %72, %69, %73 : vector<8x1xf32>
    %75 = arith.truncf %30 : vector<8x16xf32> to vector<8x16xbf16>
    %76 = arith.truncf %51 : vector<8x1xf32> to vector<8x1xbf16>
    %77 = arith.truncf %74 : vector<8x1xf32> to vector<8x1xbf16>
    %78 = vector.extract_strided_slice %75 {offsets = [0, 0], sizes = [8, 15], strides = [1, 1]} : vector<8x16xbf16> to vector<8x15xbf16>
    %79 = tpu.concatenate %76, %78 in 1 : vector<8x1xbf16>, vector<8x15xbf16> -> vector<8x16xbf16>
    %80 = vector.extract_strided_slice %75 {offsets = [0, 1], sizes = [8, 15], strides = [1, 1]} : vector<8x16xbf16> to vector<8x15xbf16>
    %81 = tpu.concatenate %80, %77 in 1 : vector<8x15xbf16>, vector<8x1xbf16> -> vector<8x16xbf16>
    %c0_55 = arith.constant 0 : index
    %c0_56 = arith.constant 0 : index
    %c0_57 = arith.constant 0 : index
    %82 = vector.load %arg6[%c0_55, %c0_56, %c0_57] : memref<3x8x8xbf16, #tpu.memory_space<vmem>>, vector<1x8x8xbf16>
    %83 = vector.shape_cast %82 : vector<1x8x8xbf16> to vector<8x8xbf16>
    %cst_58 = arith.constant dense<0.000000e+00> : vector<8x16xf32>
    %84 = tpu.matmul %83, %79, %cst_58 {dimension_numbers = #tpu.dot_dimension_numbers<[1], [0], [0], [1], [0, 0, 1, 1], [], []>} : vector<8x8xbf16>, vector<8x16xbf16>, vector<8x16xf32> -> vector<8x16xf32>
    %c1_59 = arith.constant 1 : index
    %c0_60 = arith.constant 0 : index
    %c0_61 = arith.constant 0 : index
    %85 = vector.load %arg6[%c1_59, %c0_60, %c0_61] : memref<3x8x8xbf16, #tpu.memory_space<vmem>>, vector<1x8x8xbf16>
    %86 = vector.shape_cast %85 : vector<1x8x8xbf16> to vector<8x8xbf16>
    %cst_62 = arith.constant dense<0.000000e+00> : vector<8x16xf32>
    %87 = tpu.matmul %86, %75, %cst_62 {dimension_numbers = #tpu.dot_dimension_numbers<[1], [0], [0], [1], [0, 0, 1, 1], [], []>} : vector<8x8xbf16>, vector<8x16xbf16>, vector<8x16xf32> -> vector<8x16xf32>
    %88 = arith.addf %84, %87 : vector<8x16xf32>
    %c2_63 = arith.constant 2 : index
    %c0_64 = arith.constant 0 : index
    %c0_65 = arith.constant 0 : index
    %89 = vector.load %arg6[%c2_63, %c0_64, %c0_65] : memref<3x8x8xbf16, #tpu.memory_space<vmem>>, vector<1x8x8xbf16>
    %90 = vector.shape_cast %89 : vector<1x8x8xbf16> to vector<8x8xbf16>
    %cst_66 = arith.constant dense<0.000000e+00> : vector<8x16xf32>
    %91 = tpu.matmul %90, %81, %cst_66 {dimension_numbers = #tpu.dot_dimension_numbers<[1], [0], [0], [1], [0, 0, 1, 1], [], []>} : vector<8x8xbf16>, vector<8x16xbf16>, vector<8x16xf32> -> vector<8x16xf32>
    %92 = arith.addf %88, %91 : vector<8x16xf32>
    %c0_67 = arith.constant 0 : index
    %c0_68 = arith.constant 0 : index
    %93 = vector.load %arg9[%c0_67, %c0_68] : memref<8x1xf32, #tpu.memory_space<vmem>>, vector<8x1xf32>
    %94 = vector.broadcast %93 : vector<8x1xf32> to vector<8x16xf32>
    %95 = arith.addf %92, %94 : vector<8x16xf32>
    %cst_69 = arith.constant 0.000000e+00 : f32
    %96 = vector.broadcast %cst_69 : f32 to vector<8x16xf32>
    %97 = arith.maximumf %95, %96 : vector<8x16xf32>
    %c0_70 = arith.constant 0 : index
    %c0_71 = arith.constant 0 : index
    %98 = vector.load %arg7[%c0_70, %c0_71] : memref<4x8xbf16, #tpu.memory_space<vmem>>, vector<4x8xbf16>
    %99 = arith.truncf %97 : vector<8x16xf32> to vector<8x16xbf16>
    %cst_72 = arith.constant dense<0.000000e+00> : vector<4x16xf32>
    %100 = tpu.matmul %98, %99, %cst_72 {dimension_numbers = #tpu.dot_dimension_numbers<[1], [0], [0], [1], [0, 0, 1, 1], [], []>} : vector<4x8xbf16>, vector<8x16xbf16>, vector<4x16xf32> -> vector<4x16xf32>
    %c0_73 = arith.constant 0 : index
    %c0_74 = arith.constant 0 : index
    %101 = vector.load %arg10[%c0_73, %c0_74] : memref<4x1xf32, #tpu.memory_space<vmem>>, vector<4x1xf32>
    %102 = vector.broadcast %101 : vector<4x1xf32> to vector<4x16xf32>
    %103 = arith.addf %100, %102 : vector<4x16xf32>
    %c0_75 = arith.constant 0 : index
    %c0_76 = arith.constant 0 : index
    %c0_77 = arith.constant 0 : index
    %104 = vector.load %arg2[%c0_75, %c0_76, %c0_77] : memref<1x4x16xf32, #tpu.memory_space<vmem>>, vector<1x4x16xf32>
    %105 = vector.shape_cast %104 : vector<1x4x16xf32> to vector<4x16xf32>
    %106 = arith.addf %105, %103 : vector<4x16xf32>
    %cst_78 = arith.constant 0.000000e+00 : f32
    %107 = vector.broadcast %cst_78 : f32 to vector<4x16xf32>
    %108 = arith.maximumf %106, %107 : vector<4x16xf32>
    %c0_79 = arith.constant 0 : index
    %c0_80 = arith.constant 0 : index
    %c0_81 = arith.constant 0 : index
    %109 = vector.load %arg11[%c0_79, %c0_80, %c0_81] : memref<1x4x16xf32, #tpu.memory_space<vmem>>, vector<1x4x16xf32>
    %110 = vector.shape_cast %109 : vector<1x4x16xf32> to vector<4x16xf32>
    %111 = vector.shape_cast %108 : vector<4x16xf32> to vector<1x4x16xf32>
    tpu.vector_store %arg11[%c0_79, %c0_80, %c0_81], %111 {strides = array<i32>} : memref<1x4x16xf32, #tpu.memory_space<vmem>>, vector<1x4x16xf32>,
    return
  }
  func.func @transform_0(%arg0: i32, %arg1: i32) -> (i32, i32, i32) {
    %c0_i32 = arith.constant 0 : i32
    %c0_i32_0 = arith.constant 0 : i32
    return %arg0, %c0_i32, %arg1 : i32, i32, i32
  }
  func.func @transform_1(%arg0: i32, %arg1: i32) -> (i32, i32, i32, i32) {
    %c0_i32 = arith.constant 0 : i32
    %c0_i32_0 = arith.constant 0 : i32
    %c0_i32_1 = arith.constant 0 : i32
    return %arg0, %arg1, %c0_i32, %c0_i32_0 : i32, i32, i32, i32
  }
  func.func @transform_2(%arg0: i32, %arg1: i32) -> (i32, i32, i32, i32) {
    %c0_i32 = arith.constant 0 : i32
    %c0_i32_0 = arith.constant 0 : i32
    %c0_i32_1 = arith.constant 0 : i32
    return %arg0, %arg1, %c0_i32, %c0_i32_0 : i32, i32, i32, i32
  }
  func.func @transform_3(%arg0: i32, %arg1: i32) -> (i32, i32, i32) {
    %c0_i32 = arith.constant 0 : i32
    %c0_i32_0 = arith.constant 0 : i32
    %c0_i32_1 = arith.constant 0 : i32
    %c0_i32_2 = arith.constant 0 : i32
    return %c0_i32, %c0_i32_0, %c0_i32_1 : i32, i32, i32
  }
  func.func @transform_4(%arg0: i32, %arg1: i32) -> (i32, i32, i32) {
    %c0_i32 = arith.constant 0 : i32
    %c0_i32_0 = arith.constant 0 : i32
    %c0_i32_1 = arith.constant 0 : i32
    %c0_i32_2 = arith.constant 0 : i32
    return %c0_i32, %c0_i32_0, %c0_i32_1 : i32, i32, i32
  }
  func.func @transform_5(%arg0: i32, %arg1: i32) -> (i32, i32) {
    %c0_i32 = arith.constant 0 : i32
    %c0_i32_0 = arith.constant 0 : i32
    %c0_i32_1 = arith.constant 0 : i32
    return %c0_i32, %c0_i32_0 : i32, i32
  }
  func.func @transform_6(%arg0: i32, %arg1: i32) -> (i32, i32) {
    %c0_i32 = arith.constant 0 : i32
    %c0_i32_0 = arith.constant 0 : i32
    %c0_i32_1 = arith.constant 0 : i32
    return %c0_i32, %c0_i32_0 : i32, i32
  }
  func.func @transform_7(%arg0: i32, %arg1: i32) -> (i32, i32) {
    %c0_i32 = arith.constant 0 : i32
    %c0_i32_0 = arith.constant 0 : i32
    %c0_i32_1 = arith.constant 0 : i32
    return %c0_i32, %c0_i32_0 : i32, i32
  }
  func.func @transform_8(%arg0: i32, %arg1: i32) -> (i32, i32) {
    %c0_i32 = arith.constant 0 : i32
    %c0_i32_0 = arith.constant 0 : i32
    %c0_i32_1 = arith.constant 0 : i32
    return %c0_i32, %c0_i32_0 : i32, i32
  }
  func.func @transform_9(%arg0: i32, %arg1: i32) -> (i32, i32, i32) {
    %c0_i32 = arith.constant 0 : i32
    %c0_i32_0 = arith.constant 0 : i32
    return %arg0, %c0_i32, %arg1 : i32, i32, i32
  }
}

</mosaic_0001>

<bundles_post_ra>
// kernel: resnet_block1.1
= control target key start
LH: loop header
LB: loop body
LE: loop exit
PB: predicated region body
PF: predicated region fallthrough
CT: control target
= control target key end

     0   :  { %14 = vsyncpa [#allocation3], 0  ;;  %s1283_s0 = inlined_call_operand.vmem [shape: f32[2,4,16], index: 0, kind: input, shape index: {}]   ;;  %s1284_s1 = inlined_call_operand.vmem [shape: f32[2,1,4,2], index: 1, kind: input, shape index: {}]   ;;  %s1285_s2 = inlined_call_operand.vmem [shape: f32[2,1,4,2], index: 2, kind: input, shape index: {}]   ;;  %s1286_s3 = inlined_call_operand.vmem [shape: bf16[3,8,4], index: 3, kind: input, shape index: {}]   ;;  %s1287_s4 = inlined_call_operand.vmem [shape: bf16[3,8,8], index: 4, kind: input, shape index: {}]   ;;  %s1288_s5 = inlined_call_operand.vmem [shape: bf16[4,8], index: 5, kind: input, shape index: {}]   ;;  %s1289_s6 = inlined_call_operand.vmem [shape: f32[8,1], index: 6, kind: input, shape index: {}]   ;;  %s1290_s7 = inlined_call_operand.vmem [shape: f32[8,1], index: 7, kind: input, shape index: {}]   ;;  %s1291_s8 = inlined_call_operand.vmem [shape: f32[4,1], index: 8, kind: input, shape index: {}]   ;;  %s1292_s9 = inlined_call_operand.hbm [shape: f32[2,4,16], index: 9, kind: output, shape index: {}]  }
   0x1   :  { %16 = vsyncpa [#allocation3 + $0x1], 0  ;;  %s1097_s30 = smov 0   ;;  %s1099_s10 = smov 0  }
   0x2   :  { %s1101_s11 = smov 0   ;;  %s1103_s12 = smov 0  }
   0x3   :  { %s1105_s13 = smov 0   ;;  %s1107_s14 = smov 0  }
   0x4 LB: > { %s867_s15 = sadd.s32 4294967295, %s1039_s14   ;;  %s868_s16 = sadd.s32 4294967294, %s1039_s14   ;;  %s1039_s14 = sphi %s1107_s14, %s22_s14   ;;  %s1035_s13 = sphi %s1105_s13, %s1299_s13   ;;  %s1031_s12 = sphi %s1103_s12, %s1298_s12   ;;  %s1027_s11 = sphi %s1101_s11, %s1297_s11   ;;  %s1023_s10 = sphi %s1099_s10, %s1296_s10   ;;  %s1019_s30 = sphi %s1097_s30, %s1295_s30  }
   0x5   : > { %s34_s17 = sadd.s32 1, %s1035_s13  ;;  %s253_s18 = sadd.s32 1, %s1027_s11 }
   0x6   : > { %p36_p0 = scmp.ge.s32.totalorder %s34_s17, 2  ;;  %p263_p1 = scmp.ne.s32.totalorder %s1027_s11, %s1023_s10 }
   0x7   : > { %p264_p2 = scmp.eq.s32.totalorder %s867_s15, 1  ;;  %p269_p3 = scmp.ne.s32.totalorder %s1023_s10, %s1019_s30 }
   0x8   : > { %s1301_s17 = smov (%p36_p0, %s34_s17), 0  ;;  %p270_p5 = scmp.eq.s32.totalorder %s868_s16, 1 }
   0x9   : > { %p1137_p4 = por %p264_p2, %p263_p1  ;;  %s248_s20 = ssub.s32 %s1035_s13, %s1301_s17 }
   0xa   : > { %p871_p6 = scmp.ge.s32.totalorder %s1039_s14, 1  ;;  %p251_p7 = scmp.eq.s32.totalorder %s248_s20, 0 }
   0xb   : > { %p1144_p8 = por %p270_p5, %p269_p3  ;;  %p336_p9 = scmp.lt.s32.totalorder %s1039_s14, 3 }
   0xc   : > { %s1150_s22 = scalar_select %p251_p7, %s1027_s11, %s253_s18  }
   0xd   : > { %p337_p10 = pnand %p871_p6, %p336_p9 }
   0xe   : > { %p388_p11 = scmp.lt.s32.totalorder (!%p337_p10), %s1031_s12, 1  ;;  %s1043_s25 = smov (!%p337_p10), 15  }
   0xf   : > { %340 = sbr.rel (%p337_p10) target bundleno = 706 (0x2c2), region = 56  ;;  %s894_s29 = sshll.u32 (!%p337_p10), %s1031_s12, 2 }
  0x14   : > { %s389_s23 = scalar_select %p388_p11, %s1031_s12, 1  ;;  %vm448_vm0 = vcmask 1041408   ;;  %v876_v13 = vld [vmem:[%s1286_s3 + $0x4] sm:$0xf]  ;;  %vm444_vm1 = vcmask 31744   ;;  %v1044_v15 = vmov 0  }
  0x15   : > { %v504_v14 = vld [vmem:[%s1289_s6] sm:$0xff]  ;;  %958 = vset.pattern.permute.xlu2 %v1044_v15  ;;  %959 = vset.pattern.permute.xlu1 %v1044_v15  ;;  %v1046_v16 = vmov 0.0|0.0   ;;  %vm426_vm2 = vcmask 7168   ;;  %vm437_vm3 = vcmask 121856   ;;  %v1199_v30 = vld [vmem:[%s1286_s3 + $0x8] sm:$0xf] }
  0x16   : > { %s873_s24 = sshll.u32 %s389_s23, 2  ;;  %s1041_s23 = smov 127   ;;  %507 = vperm.xlu2 %958, %v504_v14   ;;  %960 = vset.pattern.permute.xlu0 %v1044_v15  ;;  %v640_v17 = vunpack.c.l.b16 %v1046_v16  ;;  %v720_v22 = vld [vmem:[%s1291_s8] sm:$0xf]  ;;  %vm654_vm4 = vcmask 1043456   ;;  %vm650_vm5 = vcmask 64512  }
  0x17   : > { %s401_s27 = scalar_lea.vmem %s1284_s1, %s873_s24  ;;  %s394_s15 = scalar_lea.vmem %s1283_s0, %s873_s24  ;;  %v441_v29 = vld [vmem:[%s1286_s3] sm:$0xf]  ;;  %v887_v53 = vld [vmem:[%s1287_s4 + $0x4] sm:$0xf]  ;;  %vm747_vm6 = vcmask 125952  }
  0x18   : > { %v412_v0 = vld [vmem:[%s401_s27] sm:$0xf]  ;;  %s408_s20 = scalar_lea.vmem %s1285_s2, %s873_s24  ;;  %s1042_s24 = smov 1   ;;  %v641_v18 = vpack.c.b16 %v640_v17, %v640_v17 }
  0x19   : > { %v1160_v1 = vld [vmem:[%s394_s15] sm:$0xf]  ;;  %v1165_v2 = vpack.c.bf16 %v412_v0, %v412_v0  ;;  %s1045_s15 = smov 113   ;;  %s385_s27 = sand.u32 1, %s1023_s10  }
  0x1a   : > { %v411_v3 = vpack.c.bf16 %v1160_v1, %v1160_v1  ;;  %v414_v4 = vld [vmem:[%s408_s20] sm:$0xf]  ;;  %s872_s28 = sshll.u32 %s385_s27, 2  ;;  %s750_s12 = scalar_lea.sflag [#allocation3], %s385_s27 }
  0x1b   : > { %v417_v5 = vunpack.c.l.b16 %v1165_v2  ;;  %v415_v7 = vpack.c.bf16 %v414_v4, %v414_v4  ;;  %v710_v54 = vld [vmem:[%s1290_s7] sm:$0xff]  ;;  %v528_v55 = vsel %vm448_vm0, %v1165_v2, 0 }
  0x1c   : > { %v422_v6 = vunpack.c.l.b16 %v411_v3  ;;  %v450_v12 = vsel %vm448_vm0, %v411_v3, 0  ;;  %v647_v2 = vld [vmem:[%s1287_s4] sm:$0xf] }
  0x1d   : > { %v418_v8 = vpack.c.b16 %v417_v5, %v417_v5  ;;  %v433_v10 = vunpack.c.l.b16 %v415_v7  ;;  %459 = vmatpush.bf16.msra.mxu0 %v450_v12  ;;  %v565_v35 = vsel %vm448_vm0, %v415_v7, 0  ;;  %v890_v5 = vld [vmem:[%s1287_s4 + $0x8] sm:$0xf] }
  0x1e   : > { %v423_v9 = vpack.c.b16 %v422_v6, %v422_v6 }
  0x1f   : > { %419 = vrot.lane.b32.xlu1 %v418_v8, %s1041_s23  ;;  %v1172_v11 = vpack.c.b16 %v433_v10, %v433_v10 }
  0x20   : > { %430 = vrot.lane.b32.xlu0 %v423_v9, %s1041_s23  ;;  %877 = vmatmul.msk.bf16.vlgmr.msra.gmra.mxu0 %vm444_vm1, %v876_v13 }
  0x21   : > { %580 = vrot.lane.b32.xlu2 %v423_v9, %s1045_s15  ;;  %537 = vmatpush.bf16.msrb.mxu0 %v528_v55  ;;  %s981_s15 = scalar_lea.hbm %s1292_s9, 8 }
  0x27   : > { %424 = vrot.lane.b32.xlu1 %v423_v9, %s1042_s24 }
  0x28   : > { %435 = vrot.lane.b32.xlu0 %v1172_v11, %s1043_s25 }
  0x29   : > { %642 = vrot.lane.b32.xlu2 %v641_v18, %s1043_s25 }
  0x30   : > { %882 = vmatmul.msk.bf16.vlgmr.msrb.gmra.mxu0 %vm444_vm1, %v441_v29 }
  0x31   : > { %723 = vperm.xlu2 %958, %v720_v22  }
  0x70   : > { %v508_v33 = vpop.permute.xlu2 %507 }
  0x7b   : > { %v581_v34 = vpop.permute.xlu2 %580 }
  0x7c   : > { %v583_v36 = vsel %vm448_vm0, %v581_v34, 0 }
  0x83   : > { %v643_v60 = vpop.permute.xlu2 %642 }
  0x91   : > { %v420_v19 = vpop.permute.xlu1 %419 }
  0x92   : > { %v431_v20 = vpop.permute.xlu0 %430  ;;  %v512_v21 = vsel %vm448_vm0, %v420_v19, 0 }
  0x93   : > { %521 = vmatpush.bf16.msra.mxu3 %v512_v21 }
  0x96   : > { %881 = vmatmul.msk.bf16.vlgmr.msra.gmra.mxu3 %vm444_vm1, %v876_v13 }
  0x97   : > { %592 = vmatpush.bf16.msrb.mxu3 %v583_v36 }
  0x99   : > { %v425_v23 = vpop.permute.xlu1 %424 }
  0x9a   : > { %v436_v24 = vpop.permute.xlu0 %435  ;;  %v429_v25 = vsel %vm426_vm2, %v420_v19, %v425_v23  ;;  %v718_v23 = vld [vmem:[%s1288_s5] sm:$0x3] }
  0x9b   : > { %v440_v26 = vsel %vm437_vm3, %v431_v20, %v436_v24  ;;  %v468_v27 = vsel %vm448_vm0, %v429_v25, 0 }
  0x9c   : > { %v488_v28 = vsel %vm448_vm0, %v440_v26, 0  ;;  %477 = vmatpush.bf16.msra.mxu1 %v468_v27  ;;  %v724_v26 = vpop.permute.xlu2 %723 }
  0x9d   : > { %497 = vmatpush.bf16.msra.mxu2 %v488_v28  ;;  %v461_v31 = vpop.f32.mrf.mxu0 }
  0x9f   : > { %878 = vmatmul.msk.bf16.vlgmr.msra.gmra.mxu1 %vm444_vm1, %v441_v29 }
  0xa0   : > { %550 = vmatpush.bf16.msrb.mxu1 %v450_v12  ;;  %880 = vmatmul.msk.bf16.vlgmr.msra.gmra.mxu2 %vm444_vm1, %v1199_v30 }
  0xa1   : > { %574 = vmatpush.bf16.msrb.mxu2 %v565_v35 }
  0xa5   : > { %v463_v32 = vpop.f32.mrf.mxu0 }
  0xa6   : > { %885 = vmatmul.msk.bf16.vlgmr.msrb.gmra.mxu3 %vm444_vm1, %v441_v29 }
  0xad   : > { %v539_v9 = vpop.f32.mrf.mxu0 }
  0xaf   : > { %883 = vmatmul.msk.bf16.vlgmr.msrb.gmra.mxu1 %vm444_vm1, %v1199_v30 }
  0xb0   : > { %884 = vmatmul.msk.bf16.vlgmr.msrb.gmra.mxu2 %vm444_vm1, %v876_v13 }
 0x119   : > { %v523_v37 = vpop.f32.mrf.mxu3 }
 0x11c   : > { %v479_v38 = vpop.f32.mrf.mxu1 }
 0x11d   : > { %v480_v39 = vadd.f32 %v479_v38, %v461_v31 }
 0x121   : > { %v525_v40 = vpop.f32.mrf.mxu3 }
 0x123   : > { %v499_v41 = vpop.f32.mrf.mxu2 }
 0x124   : > { %v503_v42 = vadd.f32 %v499_v41, %v480_v39  ;;  %v481_v43 = vpop.f32.mrf.mxu1 }
 0x126   : > { %v510_v44 = vadd.f32 %v508_v33, %v503_v42 }
 0x128   : > { %v511_v45 = vmax.f32 %v510_v44, 0.0 }
 0x129   : > { %v594_v57 = vpop.f32.mrf.mxu3 }
 0x12a   : > { %v626_v46 = vpack.c.bf16 %v511_v45, %v511_v45 }
 0x12b   : > { %v501_v47 = vpop.f32.mrf.mxu2 }
 0x12c   : > { %v656_v48 = vsel %vm654_vm4, %v626_v46, 0  ;;  %v630_v49 = vunpack.c.l.b16 %v626_v46  ;;  %v552_v50 = vpop.f32.mrf.mxu1 }
 0x12d   : > { %665 = vmatpush.bf16.msra.mxu1 %v656_v48 }
 0x12e   : > { %v631_v51 = vpack.c.b16 %v630_v49, %v630_v49 }
 0x130   : > { %637 = vrot.lane.b32.xlu1 %v631_v51, %s1041_s23  ;;  %632 = vrot.lane.b32.xlu0 %v631_v51, %s1042_s24  ;;  %s387_s24 = scalar_lea.vmem [#allocation2], %s872_s28 }
 0x131   : > { %888 = vmatmul.msk.bf16.vlgmr.msra.gmra.mxu1 %vm650_vm5, %v887_v53  ;;  %v596_v59 = vpop.f32.mrf.mxu3  ;;  %s763_s18 = sshll.u32 %s387_s24, 4  ;;  %s764_s18 = int_to_ptr.vmem [resolvable:$true] %s763_s18 }
 0x133   : > { %v576_v56 = vpop.f32.mrf.mxu2 }
 0x134   : > { %v554_v52 = vpop.f32.mrf.mxu1 }
 0x138   : > { %598 = vrot.lane.b32.xlu0 %v1172_v11, %s1041_s23  ;;  %713 = vperm.xlu1 %959, %v710_v54   ;;  %v541_v11 = vpop.f32.mrf.mxu0  ;;  %s761_s23 = scalar_lea.hbm %s1292_s9, %s894_s29 }
 0x139   : > { %s765_s20 = sshll.u32 %s761_s23, 4  ;;  %s766_s20 = int_to_ptr.hbm [resolvable:$true] %s765_s20 }
 0x13a   : > { %s975_s25 = sshra.s32 %s766_s20, 4  ;;  %s976_s25 = int_to_ptr.hbm [resolvable:$true] %s975_s25 }
 0x13b   : > { %v578_v58 = vpop.f32.mrf.mxu2  ;;  %s977_s26 = scalar_lea.hbm %s976_s25, 4  ;;  %p982_p1 = scmp.lt.s32.totalorder %s976_s25, %s1292_s9 }
 0x13c   : > { %p978_p12 = scmp.ne.s32.totalorder %s976_s25, %s977_s26  ;;  %p983_p2 = scmp.lt.s32.totalorder %s981_s15, %s977_s26 }
 0x13e   : > { %p979_p13 = pnand %p978_p12, %p1137_p4  ;;  %p984_p3 = por %p983_p2, %p982_p1 }
 0x140   : > { %p980_p0 = pneg %p979_p13 }
 0x142   : > { %p985_p5 = pnand %p984_p3, %p980_p0 }
 0x1a2   : > { %v638_v61 = vpop.permute.xlu1 %637  ;;  %v633_v62 = vpop.permute.xlu0 %632 }
 0x1a3   : > { %v646_v63 = vsel %vm437_vm3, %v638_v61, %v643_v60  ;;  %v636_v0 = vsel %vm426_vm2, 0.0|0.0, %v633_v62 }
 0x1a4   : > { %v694_v3 = vsel %vm654_vm4, %v646_v63, 0  ;;  %v674_v4 = vsel %vm654_vm4, %v636_v0, 0 }
 0x1a5   : > { %683 = vmatpush.bf16.msra.mxu2 %v674_v4  ;;  %703 = vmatpush.bf16.msra.mxu3 %v694_v3 }
 0x1a8   : > { %889 = vmatmul.msk.bf16.vlgmr.msra.gmra.mxu2 %vm650_vm5, %v647_v2  ;;  %891 = vmatmul.msk.bf16.vlgmr.msra.gmra.mxu3 %vm650_vm5, %v890_v5 }
 0x1aa   : > { %v599_v6 = vpop.permute.xlu0 %598  ;;  %v714_v15 = vpop.permute.xlu1 %713 }
 0x1ab   : > { %v601_v7 = vsel %vm448_vm0, %v599_v6, 0 }
 0x1ac   : > { %610 = vmatpush.bf16.msra.mxu0 %v601_v7 }
 0x1ae   : > { %v667_v8 = vpop.f32.mrf.mxu1 }
 0x1af   : > { %886 = vmatmul.msk.bf16.vlgmr.msra.gmra.mxu0 %vm444_vm1, %v1199_v30 }
 0x1b6   : > { %v669_v10 = vpop.f32.mrf.mxu1 }
 0x22b   : > { %v685_v12 = vpop.f32.mrf.mxu2  ;;  %v705_v13 = vpop.f32.mrf.mxu3 }
 0x22c   : > { %v686_v14 = vadd.f32 %v685_v12, %v667_v8  ;;  %v612_v24 = vpop.f32.mrf.mxu0 }
 0x22e   : > { %v709_v16 = vadd.f32 %v705_v13, %v686_v14 }
 0x230   : > { %v716_v17 = vadd.f32 %v714_v15, %v709_v16 }
 0x232   : > { %v717_v18 = vmax.f32 %v716_v17, 0.0 }
 0x233   : > { %v687_v19 = vpop.f32.mrf.mxu2  ;;  %v707_v20 = vpop.f32.mrf.mxu3 }
 0x234   : > { %v719_v21 = vpack.c.bf16 %v717_v18, %v717_v18  ;;  %v614_v25 = vpop.f32.mrf.mxu0 }
 0x236   : > { %v730_v22 = vsel %vm654_vm4, %v719_v21, 0 }
 0x237   : > { %739 = vmatpush.bf16.msrb.mxu0 %v730_v22 }
 0x23a   : > { %892 = vmatmul.msk.bf16.vlgmr.msrb.gmra.mxu0 %vm650_vm5, %v718_v23 }
 0x2b7   : > { %v741_v27 = vpop.f32.mrf.mxu0 }
 0x2b8   : > { %v742_v28 = vadd.f32 %v741_v27, %v724_v26 }
 0x2ba   : > { %v745_v29 = vadd.f32 %v742_v28, %v1160_v1 }
 0x2bc   : > { %v746_v30 = vmax.f32 %v745_v29, 0.0 }
 0x2be   : > { %748 = vst.msk [vmem:[%s387_s24] sm:$0xf] %vm747_vm6, %v746_v30 }
 0x2bf   : > { %v743_v31 = vpop.f32.mrf.mxu0 }
 0x2c0   : > { %988 = shalt.err (!%p985_p5)
}
 0x2c1   : > { %897 = dma.vmem_to_hbm [thread:$0]  (%p1137_p4), %s764_s18, 64, %s766_s20, %s750_s12  }
 0x2c2 PF: > { %p903_p6 = scmp.ge.s32.totalorder %s1039_s14, 2  ;;  %s777_s27 = sand.u32 1, %s1019_s30  }
 0x2c3   : > { %s778_s24 = scalar_lea.sflag [#allocation3], %s777_s27 }
 0x2c4   : > { %p900_p7 = pnand %p903_p6, %p1144_p8 }
 0x2c6   : > { %p901_p9 = pneg %p900_p7 }
 0x2c8   : > { %1014 = dma.done.wait (%p901_p9), %s778_s24, 64  }
 0x2c9   : > { %1016 = vsyncadd (%p901_p9), %s778_s24, 4294967232  ;;  %s22_s14 = sadd.s32 1, %s1039_s14   ;;  %s1295_s30 = smov %s1023_s10 }
 0x2ca   : > { %p19_p10 = scmp.ge.s32.totalorder %s22_s14, 4   ;;  %s1296_s10 = smov %s1027_s11 }
 0x2cb   : > { %s1297_s11 = smov %s1150_s22  ;;  %s1298_s12 = smov %s1035_s13 }
 0x2cc   : > { %s1299_s13 = smov %s1301_s17  ;;  %21 = sbr.rel (!%p19_p10) target bundleno = 4 (0x4), region = 101 }
 0x2d1   :  { %784 = vsyncpa [#allocation3], 1 }
 0x2d2   :  { %786 = vsyncpa [#allocation3 + $0x1], 1 }

</bundles_post_ra>
